<compile_context>
chip_gen: v7x
topology: tpu7x:2x2x1
jax: 0.10.0
libtpu: 0.0.40
codegen_flags: <defaults>
</compile_context>

<pallas_src>
import jax
import jax.numpy as jnp
from jax import lax
from jax.experimental import pallas as pl
from jax.experimental.pallas import tpu as pltpu

EPS = 1e-5

# -------------------- model dimensions (small demo sizes) --------------------
N_NODES = 8        # graph nodes  (X.shape[0], adj is N x N)
GRAPH_DIM = 16     # graph feature dim
HIDDEN1 = 32       # hidden1_dim
HIDDEN2 = 16       # hidden2_dim
BIPARTITE = 8      # bipartite_dim; bi_networks is (BIPARTITE, BIPARTITE)

SLAB_LANES = 128   # lane-dense slab width
OUT_LANES = 128    # lane-dense output width
OUT_ROWS = max(N_NODES, BIPARTITE)


# ----------------------- packed-slab layouts (static) ------------------------
def _pad8(n):
    return ((n + 7) // 8) * 8


def _make_layout(entries):
    off = {}
    row = 0
    for name, r, c in entries:
        off[name] = (row, r, c)
        row += _pad8(r)
    return off, _pad8(row)


# static (per-model) parameter slab — packed ONCE, cached outside the call path
_P_LAYOUT, P_ROWS = _make_layout((
    ("w1ms", GRAPH_DIM, 2 * HIDDEN2),   # fused W1 @ [Wm | Ws]
    ("l1_w", BIPARTITE, HIDDEN1),
    ("l1_b", 1,         HIDDEN1),
    ("l2_w", HIDDEN1,   HIDDEN2),
    ("l2_b", 1,         HIDDEN2),
    ("w_bi", BIPARTITE, HIDDEN2),
))

# per-call data slab
_D_LAYOUT, D_ROWS = _make_layout((
    ("x",       N_NODES,   GRAPH_DIM),
    ("adj",     N_NODES,   N_NODES),
    ("noise_c", N_NODES,   HIDDEN2),
    ("bi",      BIPARTITE, BIPARTITE),
    ("noise_t", BIPARTITE, HIDDEN2),
))


def _get(ref, layout, name):
    off, rows, cols = layout[name]
    return ref[pl.ds(off, rows), pl.ds(0, cols)]


# -------------------------------- the kernel ---------------------------------
def recommend_kernel(ab_ref, pslab_ref, dslab_ref, out_ref):
    inv_a = ab_ref[0]          # wrapper passes 1/a (no in-kernel divide)
    b = ab_ref[1]

    x       = _get(dslab_ref, _D_LAYOUT, "x")
    adj     = _get(dslab_ref, _D_LAYOUT, "adj")
    noise_c = _get(dslab_ref, _D_LAYOUT, "noise_c")
    bi      = _get(dslab_ref, _D_LAYOUT, "bi")
    noise_t = _get(dslab_ref, _D_LAYOUT, "noise_t")

    w1ms = _get(pslab_ref, _P_LAYOUT, "w1ms")
    l1_w = _get(pslab_ref, _P_LAYOUT, "l1_w")
    l1_b = _get(pslab_ref, _P_LAYOUT, "l1_b")
    l2_w = _get(pslab_ref, _P_LAYOUT, "l2_w")
    l2_b = _get(pslab_ref, _P_LAYOUT, "l2_b")
    w_bi = _get(pslab_ref, _P_LAYOUT, "w_bi")

    # ---- GCN encoder (encode), reassociated:
    #      [mean | logstd] = (adj @ adj) @ (X @ (W1 @ [Wm | Ws]))
    #      the two inner dots are independent -> only 2 serial MXU results.
    adj2 = jnp.dot(adj, adj, preferred_element_type=jnp.float32)      # (N, N)
    xw = jnp.dot(x, w1ms, preferred_element_type=jnp.float32)         # (N, 2*H2)
    ml = jnp.dot(adj2, xw, preferred_element_type=jnp.float32)        # (N, 2*H2)
    mean = ml[:, :HIDDEN2]
    logstd = ml[:, HIDDEN2:]
    z_c = noise_c * jnp.exp(logstd) + mean                            # (N, H2)

    # ---- encoder_with_MLP ----
    h1 = jnp.dot(bi, l1_w, preferred_element_type=jnp.float32) + l1_b
    h2 = jax.nn.sigmoid(h1)
    h3 = jnp.dot(h2, l2_w, preferred_element_type=jnp.float32) + l2_b
    mu = jnp.maximum(w_bi * h3, 0.0)                                  # relu(weight * h3)
    z_t = noise_t * jnp.exp(mu) + mu                                  # (M, H2)

    # ---- fused pairwise-distance decode:
    #      lanes [0, N)          -> A_pred           (cdist(z_c, z_c))
    #      lanes [N, N+M)        -> bi_network_pred  (cdist(z_c_pad, z_t))
    dims = (((1,), (1,)), ((), ()))                    # contract last dims
    ones_row = jnp.ones((1, HIDDEN2), jnp.float32)

    # LHS: z_c zero-padded (or truncated) to OUT_ROWS rows — matches the
    # zeros-then-copy loop of bipartite_decode.
    if N_NODES < OUT_ROWS:
        lhs = jnp.concatenate(
            [z_c, jnp.zeros((OUT_ROWS - N_NODES, HIDDEN2), jnp.float32)], axis=0)
    else:
        lhs = z_c

    z_rhs = jnp.concatenate([z_c, z_t], axis=0)        # (N + M, H2)

    gram = lax.dot_general(lhs, z_rhs, dims,
                           preferred_element_type=jnp.float32)        # (R, N+M)
    sq_row = lax.dot_general(ones_row, z_rhs * z_rhs, dims,
                             preferred_element_type=jnp.float32)      # (1, N+M)
    sq_col = jnp.sum(lhs * lhs, axis=1, keepdims=True)                # (R, 1)

    sq_dist = jnp.maximum(sq_col + sq_row - 2.0 * gram, 0.0)          # (R, N+M)
    # 1/(sqrt(s)+eps) ~= rsqrt(s + eps^2): eps only matters where s ~ 0,
    # where the sigmoid saturates to 1 either way.
    inv_d = lax.rsqrt(sq_dist + EPS * EPS)
    preds = jax.nn.sigmoid(inv_d * inv_a - b)                         # (R, N+M)

    # ---- lane-dense packed output: one full-width unmasked store ----
    pad_lanes = OUT_LANES - (N_NODES + BIPARTITE)
    out_ref[...] = jnp.concatenate(
        [preds, jnp.zeros((OUT_ROWS, pad_lanes), jnp.float32)], axis=1)


# ------------------------------- JAX wrapper ----------------------------------
def _pack_slab(layout, n_rows, tensors):
    slab = jnp.zeros((n_rows, SLAB_LANES), jnp.float32)
    for name, arr in tensors.items():
        off, rows, cols = layout[name]
        slab = slab.at[off:off + rows, 0:cols].set(
            jnp.asarray(arr, jnp.float32).reshape(rows, cols))
    return slab


def pack_param_slab(params):
    """Static per-model packing — call once and reuse the result."""
    w1ms = jnp.dot(jnp.asarray(params["w1"], jnp.float32),
                   jnp.asarray(params["wms"], jnp.float32))  # (GRAPH_DIM, 2*H2)
    pslab = _pack_slab(_P_LAYOUT, P_ROWS, {
        "w1ms": w1ms,
        "l1_w": params["l1_w"], "l1_b": params["l1_b"],
        "l2_w": params["l2_w"], "l2_b": params["l2_b"],
        "w_bi": params["w_bi"],
    })
    ab = jnp.array([1.0 / params["a"], params["b"]], dtype=jnp.float32)
    return pslab, ab


def recommend_via_feedback(param_slab, ab, X, adj, bi_networks, noise_c, noise_t):
    dslab = _pack_slab(_D_LAYOUT, D_ROWS, {
        "x": X, "adj": adj, "noise_c": noise_c,
        "bi": bi_networks, "noise_t": noise_t,
    })

    out = pl.pallas_call(
        recommend_kernel,
        out_shape=jax.ShapeDtypeStruct((OUT_ROWS, OUT_LANES), jnp.float32),
        in_specs=[pl.BlockSpec(memory_space=pltpu.MemorySpace.SMEM),
                  pl.BlockSpec(memory_space=pltpu.MemorySpace.VMEM),
                  pl.BlockSpec(memory_space=pltpu.MemorySpace.VMEM)],
        out_specs=pl.BlockSpec(memory_space=pltpu.MemorySpace.VMEM),
    )(ab, param_slab, dslab)

    A_pred = out[:N_NODES, :N_NODES]
    bi_pred = out[:BIPARTITE, N_NODES:N_NODES + BIPARTITE]
    return A_pred, bi_pred


# ------------------------------ param / data init -----------------------------
def glorot(key, in_dim, out_dim):
    r = jnp.sqrt(6.0 / (in_dim + out_dim))
    return jax.random.uniform(key, (in_dim, out_dim), jnp.float32, -r, r)


def make_params(key):
    ks = jax.random.split(key, 8)
    wm = glorot(ks[1], HIDDEN1, HIDDEN2)
    ws = glorot(ks[2], HIDDEN1, HIDDEN2)
    return {
        "w1":   glorot(ks[0], GRAPH_DIM, HIDDEN1),
        "wms":  jnp.concatenate([wm, ws], axis=1),   # [wm | ws]
        # nn.Linear weights stored pre-transposed (in_dim, out_dim)
        "l1_w": glorot(ks[3], BIPARTITE, HIDDEN1),
        "l1_b": jax.random.uniform(ks[4], (1, HIDDEN1), jnp.float32, -0.1, 0.1),
        "l2_w": glorot(ks[5], HIDDEN1, HIDDEN2),
        "l2_b": jax.random.uniform(ks[6], (1, HIDDEN2), jnp.float32, -0.1, 0.1),
        "w_bi": glorot(ks[7], BIPARTITE, HIDDEN2),
        "a": 0.8,
        "b": 7.0,
    }


# ------------------------------ pure-JAX reference ----------------------------
def reference(params, X, adj, bi, noise_c, noise_t):
    wm = params["wms"][:, :HIDDEN2]
    ws = params["wms"][:, HIDDEN2:]

    def decode(zl, zr):
        d = jnp.sqrt(jnp.sum((zl[:, None, :] - zr[None, :, :]) ** 2, axis=-1))
        x = 1.0 / (d + EPS)
        return jax.nn.sigmoid(x / params["a"] - params["b"])

    hidden = adj @ (X @ params["w1"])
    mean = adj @ (hidden @ wm)
    logstd = adj @ (hidden @ ws)
    z_c = noise_c * jnp.exp(logstd) + mean
    A_pred = decode(z_c, z_c)

    h1 = bi @ params["l1_w"] + params["l1_b"]
    h2 = jax.nn.sigmoid(h1)
    h3 = h2 @ params["l2_w"] + params["l2_b"]
    mu = jnp.maximum(params["w_bi"] * h3, 0.0)
    z_t = noise_t * jnp.exp(mu) + mu

    M = z_t.shape[0]
    z_c_pad = jnp.zeros((M, z_t.shape[1]), jnp.float32).at[: min(z_c.shape[0], M)].set(
        z_c[:M])
    bi_pred = decode(z_c_pad, z_t)
    return A_pred, bi_pred


# ----------------------------------- main --------------------------------------
if __name__ == "__main__":
    key = jax.random.PRNGKey(0)
    k_par, k_x, k_adj, k_bi, k_nc, k_nt = jax.random.split(key, 6)

    params = make_params(k_par)
    # static per-model packing, done once (not in the per-call path)
    param_slab, ab = pack_param_slab(params)

    X = 0.1 * jax.random.normal(k_x, (N_NODES, GRAPH_DIM), jnp.float32)

    # random symmetric adjacency with self loops, row-normalized
    raw = (jax.random.uniform(k_adj, (N_NODES, N_NODES)) > 0.5).astype(jnp.float32)
    adj = jnp.minimum(raw + raw.T + jnp.eye(N_NODES, dtype=jnp.float32), 1.0)
    adj = adj / jnp.sum(adj, axis=1, keepdims=True)

    bi_networks = (jax.random.uniform(k_bi, (BIPARTITE, BIPARTITE)) > 0.5).astype(jnp.float32)

    # deterministic "gaussian_noise" (stands in for torch.randn)
    noise_c = jax.random.normal(k_nc, (N_NODES, HIDDEN2), jnp.float32)
    noise_t = jax.random.normal(k_nt, (BIPARTITE, HIDDEN2), jnp.float32)

    A_pred, bi_pred = recommend_via_feedback(param_slab, ab, X, adj, bi_networks,
                                             noise_c, noise_t)
    jax.block_until_ready((A_pred, bi_pred))

    A_ref, bi_ref = reference(params, X, adj, bi_networks, noise_c, noise_t)
    assert A_pred.shape == (N_NODES, N_NODES)
    assert bi_pred.shape == (BIPARTITE, BIPARTITE)
    # tolerance accounts for the reassociated encoder, gram-matrix cdist and
    # the rsqrt(s + eps^2) distance inverse (sigmoid output in [0,1])
    assert jnp.allclose(A_pred, A_ref, atol=1e-3, rtol=1e-3)
    assert jnp.allclose(bi_pred, bi_ref, atol=1e-3, rtol=1e-3)

    print("KERNEL_OK")
</pallas_src>

<mosaic_0001>
module attributes {stable_mosaic.version = 11 : i64} {
  func.func @recommend_kernel(%arg0: memref<2xf32, #tpu.memory_space<smem>>, %arg1: memref<80x128xf32, #tpu.memory_space<vmem>>, %arg2: memref<40x128xf32, #tpu.memory_space<vmem>>, %arg3: memref<8x128xf32, #tpu.memory_space<vmem>>) attributes {dimension_semantics = [], scalar_prefetch = 0 : i64, scratch_operands = 0 : i64, tpu.core_type = #tpu.core_type<tc>} {
    %c0 = arith.constant 0 : index
    %0 = memref.load %arg0[%c0] : memref<2xf32, #tpu.memory_space<smem>>
    %c1 = arith.constant 1 : index
    %1 = memref.load %arg0[%c1] : memref<2xf32, #tpu.memory_space<smem>>
    %c0_0 = arith.constant 0 : index
    %c0_1 = arith.constant 0 : index
    %2 = vector.load %arg2[%c0_0, %c0_1] : memref<40x128xf32, #tpu.memory_space<vmem>>, vector<8x16xf32>
    %c8 = arith.constant 8 : index
    %c0_2 = arith.constant 0 : index
    %3 = vector.load %arg2[%c8, %c0_2] : memref<40x128xf32, #tpu.memory_space<vmem>>, vector<8x8xf32>
    %c16 = arith.constant 16 : index
    %c0_3 = arith.constant 0 : index
    %4 = vector.load %arg2[%c16, %c0_3] : memref<40x128xf32, #tpu.memory_space<vmem>>, vector<8x16xf32>
    %c24 = arith.constant 24 : index
    %c0_4 = arith.constant 0 : index
    %5 = vector.load %arg2[%c24, %c0_4] : memref<40x128xf32, #tpu.memory_space<vmem>>, vector<8x8xf32>
    %c32 = arith.constant 32 : index
    %c0_5 = arith.constant 0 : index
    %6 = vector.load %arg2[%c32, %c0_5] : memref<40x128xf32, #tpu.memory_space<vmem>>, vector<8x16xf32>
    %c0_6 = arith.constant 0 : index
    %c0_7 = arith.constant 0 : index
    %7 = vector.load %arg1[%c0_6, %c0_7] : memref<80x128xf32, #tpu.memory_space<vmem>>, vector<16x32xf32>
    %c16_8 = arith.constant 16 : index
    %c0_9 = arith.constant 0 : index
    %8 = vector.load %arg1[%c16_8, %c0_9] : memref<80x128xf32, #tpu.memory_space<vmem>>, vector<8x32xf32>
    %c24_10 = arith.constant 24 : index
    %c0_11 = arith.constant 0 : index
    %9 = vector.load %arg1[%c24_10, %c0_11] : memref<80x128xf32, #tpu.memory_space<vmem>>, vector<1x32xf32>
    %c32_12 = arith.constant 32 : index
    %c0_13 = arith.constant 0 : index
    %10 = vector.load %arg1[%c32_12, %c0_13] : memref<80x128xf32, #tpu.memory_space<vmem>>, vector<32x16xf32>
    %c64 = arith.constant 64 : index
    %c0_14 = arith.constant 0 : index
    %11 = vector.load %arg1[%c64, %c0_14] : memref<80x128xf32, #tpu.memory_space<vmem>>, vector<1x16xf32>
    %c72 = arith.constant 72 : index
    %c0_15 = arith.constant 0 : index
    %12 = vector.load %arg1[%c72, %c0_15] : memref<80x128xf32, #tpu.memory_space<vmem>>, vector<8x16xf32>
    %cst = arith.constant dense<0.000000e+00> : vector<8x8xf32>
    %13 = tpu.matmul %3, %3, %cst {dimension_numbers = #tpu.dot_dimension_numbers<[1], [0], [0], [1], [0, 0, 1, 1], [], []>} : vector<8x8xf32>, vector<8x8xf32>, vector<8x8xf32> -> vector<8x8xf32>
    %cst_16 = arith.constant dense<0.000000e+00> : vector<8x32xf32>
    %14 = tpu.matmul %2, %7, %cst_16 {dimension_numbers = #tpu.dot_dimension_numbers<[1], [0], [0], [1], [0, 0, 1, 1], [], []>} : vector<8x16xf32>, vector<16x32xf32>, vector<8x32xf32> -> vector<8x32xf32>
    %cst_17 = arith.constant dense<0.000000e+00> : vector<8x32xf32>
    %15 = tpu.matmul %13, %14, %cst_17 {dimension_numbers = #tpu.dot_dimension_numbers<[1], [0], [0], [1], [0, 0, 1, 1], [], []>} : vector<8x8xf32>, vector<8x32xf32>, vector<8x32xf32> -> vector<8x32xf32>
    %16 = vector.extract_strided_slice %15 {offsets = [0, 0], sizes = [8, 16], strides = [1, 1]} : vector<8x32xf32> to vector<8x16xf32>
    %17 = vector.extract_strided_slice %15 {offsets = [0, 16], sizes = [8, 16], strides = [1, 1]} : vector<8x32xf32> to vector<8x16xf32>
    %18 = math.exp %17 : vector<8x16xf32>
    %19 = arith.mulf %4, %18 : vector<8x16xf32>
    %20 = arith.addf %19, %16 : vector<8x16xf32>
    %cst_18 = arith.constant dense<0.000000e+00> : vector<8x32xf32>
    %21 = tpu.matmul %5, %8, %cst_18 {dimension_numbers = #tpu.dot_dimension_numbers<[1], [0], [0], [1], [0, 0, 1, 1], [], []>} : vector<8x8xf32>, vector<8x32xf32>, vector<8x32xf32> -> vector<8x32xf32>
    %22 = vector.broadcast %9 : vector<1x32xf32> to vector<8x32xf32>
    %23 = arith.addf %21, %22 : vector<8x32xf32>
    %24 = arith.negf %23 : vector<8x32xf32>
    %25 = math.exp %24 : vector<8x32xf32>
    %cst_19 = arith.constant 1.000000e+00 : f32
    %26 = vector.broadcast %cst_19 : f32 to vector<8x32xf32>
    %27 = arith.addf %26, %25 : vector<8x32xf32>
    %28 = arith.divf %26, %27 : vector<8x32xf32>
    %cst_20 = arith.constant dense<0.000000e+00> : vector<8x16xf32>
    %29 = tpu.matmul %28, %10, %cst_20 {dimension_numbers = #tpu.dot_dimension_numbers<[1], [0], [0], [1], [0, 0, 1, 1], [], []>} : vector<8x32xf32>, vector<32x16xf32>, vector<8x16xf32> -> vector<8x16xf32>
    %30 = vector.broadcast %11 : vector<1x16xf32> to vector<8x16xf32>
    %31 = arith.addf %29, %30 : vector<8x16xf32>
    %32 = arith.mulf %12, %31 : vector<8x16xf32>
    %cst_21 = arith.constant 0.000000e+00 : f32
    %33 = vector.broadcast %cst_21 : f32 to vector<8x16xf32>
    %34 = arith.maximumf %32, %33 : vector<8x16xf32>
    %35 = math.exp %34 : vector<8x16xf32>
    %36 = arith.mulf %6, %35 : vector<8x16xf32>
    %37 = arith.addf %36, %34 : vector<8x16xf32>
    %cst_22 = arith.constant 1.000000e+00 : f32
    %38 = vector.broadcast %cst_22 : f32 to vector<1x16xf32>
    %39 = tpu.concatenate %20, %37 in 0 : vector<8x16xf32>, vector<8x16xf32> -> vector<16x16xf32>
    %cst_23 = arith.constant dense<0.000000e+00> : vector<8x16xf32>
    %40 = tpu.matmul %20, %39, %cst_23 {dimension_numbers = #tpu.dot_dimension_numbers<[1], [1], [0], [0], [0, 0, 1, 0], [], []>} : vector<8x16xf32>, vector<16x16xf32>, vector<8x16xf32> -> vector<8x16xf32>
    %41 = arith.mulf %39, %39 : vector<16x16xf32>
    %cst_24 = arith.constant dense<0.000000e+00> : vector<1x16xf32>
    %42 = tpu.matmul %38, %41, %cst_24 {dimension_numbers = #tpu.dot_dimension_numbers<[1], [1], [0], [0], [0, 0, 1, 0], [], []>} : vector<1x16xf32>, vector<16x16xf32>, vector<1x16xf32> -> vector<1x16xf32>
    %43 = arith.mulf %20, %20 : vector<8x16xf32>
    %cst_25 = arith.constant dense<0.000000e+00> : vector<8xf32>
    %44 = vector.multi_reduction <add>, %43, %cst_25 [1] : vector<8x16xf32> to vector<8xf32>
    %45 = vector.shape_cast %44 : vector<8xf32> to vector<8x1xf32>
    %46 = vector.broadcast %45 : vector<8x1xf32> to vector<8x16xf32>
    %47 = vector.broadcast %42 : vector<1x16xf32> to vector<8x16xf32>
    %48 = arith.addf %46, %47 : vector<8x16xf32>
    %cst_26 = arith.constant 2.000000e+00 : f32
    %49 = vector.broadcast %cst_26 : f32 to vector<8x16xf32>
    %50 = arith.mulf %49, %40 : vector<8x16xf32>
    %51 = arith.subf %48, %50 : vector<8x16xf32>
    %cst_27 = arith.constant 0.000000e+00 : f32
    %52 = vector.broadcast %cst_27 : f32 to vector<8x16xf32>
    %53 = arith.maximumf %51, %52 : vector<8x16xf32>
    %cst_28 = arith.constant 1.000000e-10 : f32
    %54 = vector.broadcast %cst_28 : f32 to vector<8x16xf32>
    %55 = arith.addf %53, %54 : vector<8x16xf32>
    %56 = math.rsqrt %55 : vector<8x16xf32>
    %57 = vector.broadcast %0 : f32 to vector<8x16xf32>
    %58 = arith.mulf %56, %57 : vector<8x16xf32>
    %59 = vector.broadcast %1 : f32 to vector<8x16xf32>
    %60 = arith.subf %58, %59 : vector<8x16xf32>
    %61 = arith.negf %60 : vector<8x16xf32>
    %62 = math.exp %61 : vector<8x16xf32>
    %cst_29 = arith.constant 1.000000e+00 : f32
    %63 = vector.broadcast %cst_29 : f32 to vector<8x16xf32>
    %64 = arith.addf %63, %62 : vector<8x16xf32>
    %65 = arith.divf %63, %64 : vector<8x16xf32>
    %cst_30 = arith.constant 0.000000e+00 : f32
    %66 = vector.broadcast %cst_30 : f32 to vector<8x112xf32>
    %67 = tpu.concatenate %65, %66 in 1 : vector<8x16xf32>, vector<8x112xf32> -> vector<8x128xf32>
    %c0_31 = arith.constant 0 : index
    %c0_32 = arith.constant 0 : index
    %68 = vector.load %arg3[%c0_31, %c0_32] : memref<8x128xf32, #tpu.memory_space<vmem>>, vector<8x128xf32>
    tpu.vector_store %arg3[%c0_31, %c0_32], %67 {strides = array<i32>} : memref<8x128xf32, #tpu.memory_space<vmem>>, vector<8x128xf32>,
    return
  }
}

</mosaic_0001>

<bundles_post_ra>
// kernel: tpu_custom_call.1
= control target key start
LH: loop header
LB: loop body
LE: loop exit
PB: predicated region body
PF: predicated region fallthrough
CT: control target
= control target key end

     0   :  { %8 = vsyncpa [#allocation5], 0  ;;  %s971_s0 = inlined_call_operand.hbm [shape: f32[2], index: 0, kind: input, shape index: {}]   ;;  %s972_s1 = inlined_call_operand.hbm [shape: f32[80,128], index: 1, kind: input, shape index: {}]   ;;  %s973_s2 = inlined_call_operand.hbm [shape: f32[40,128], index: 2, kind: input, shape index: {}]   ;;  %s974_s3 = inlined_call_operand.hbm [shape: f32[8,128], index: 3, kind: output, shape index: {}]  }
   0x1   :  { %9 = vsyncpa [#allocation3], 0 }
   0x2   :  { %10 = vsyncpa [#allocation8], 0 }
   0x3   :  { %11 = vsyncpa [#allocation4], 0  ;;  %s791_s14 = scalar_lea.hbm %s971_s0, 16 }
   0x4   :  { %p792_p0 = scmp.ne.s32.totalorder %s971_s0, %s791_s14  ;;  %p795_p1 = scmp.lt.u32.totalorder %s791_s14, %s971_s0 }
   0x6   :  { %p797_p2 = pnand %p795_p1, %p792_p0 }
   0x8   :  { %800 = shalt.err (!%p797_p2)
}
   0x9   :  { %s875_s19 = smov [#allocation2]   ;;  %s876_s22 = smov [#allocation6]  }
   0xa   :  { %19 = dma.hbm_to_smem %s971_s0, 16, %s875_s19, [#allocation5]  }
   0xb   :  { %s25_s23 = sshll.u32 %s876_s22, 4  ;;  %s801_s26 = scalar_lea.hbm %s972_s1, 1280  ;;  %s26_s23 = int_to_ptr.vmem [resolvable:$true] %s25_s23 }
   0xc   :  { %p802_p3 = scmp.ne.s32.totalorder %s972_s1, %s801_s26  ;;  %p805_p4 = scmp.lt.u32.totalorder %s801_s26, %s972_s1 }
   0xe   :  { %p807_p5 = pnand %p805_p4, %p802_p3 }
  0x10   :  { %810 = shalt.err (!%p807_p5)
}
  0x11   :  { %s811_s4 = scalar_lea.vmem %s26_s23, 1280  ;;  %p816_p7 = scmp.lt.s32.totalorder %s26_s23, %s26_s23 }
  0x12   :  { %p812_p6 = scmp.ne.s32.totalorder %s26_s23, %s811_s4  ;;  %p817_p8 = scmp.lt.s32.totalorder %s811_s4, %s811_s4 }
  0x14   :  { %p818_p9 = por %p817_p8, %p816_p7 }
  0x16   :  { %p819_p10 = pnand %p818_p9, %p812_p6 }
  0x18   :  { %822 = shalt.err (!%p819_p10)
}
  0x19   :  { %s877_s0 = smov 128   ;;  %s878_s5 = smov 8  }
  0x1a   :  { %31 = dma.hbm_to_vmem [thread:$0]  %s972_s1, 1280, %s26_s23, [#allocation3], %s877_s0, %s877_s0, %s878_s5  }
  0x1b   :  { %s879_s8 = smov [#allocation7]   ;;  %s823_s12 = scalar_lea.hbm %s973_s2, 640 }
  0x1c   :  { %s37_s9 = sshll.u32 %s879_s8, 4  ;;  %p824_p11 = scmp.ne.s32.totalorder %s973_s2, %s823_s12  ;;  %s38_s9 = int_to_ptr.vmem [resolvable:$true] %s37_s9 }
  0x1d   :  { %p827_p12 = scmp.lt.u32.totalorder %s823_s12, %s973_s2 }
  0x1f   :  { %p829_p13 = pnand %p827_p12, %p824_p11 }
  0x21   :  { %832 = shalt.err (!%p829_p13)
}
  0x22   :  { %s833_s17 = scalar_lea.vmem %s38_s9, 640  ;;  %p838_p1 = scmp.lt.s32.totalorder %s38_s9, %s38_s9 }
  0x23   :  { %p834_p0 = scmp.ne.s32.totalorder %s38_s9, %s833_s17  ;;  %p839_p2 = scmp.lt.s32.totalorder %s833_s17, %s833_s17 }
  0x25   :  { %p840_p3 = por %p839_p2, %p838_p1 }
  0x27   :  { %p841_p4 = pnand %p840_p3, %p834_p0 }
  0x29   :  { %844 = shalt.err (!%p841_p4)
}
  0x2a   :  { %43 = dma.hbm_to_vmem [thread:$0]  %s973_s2, 640, %s38_s9, [#allocation8], %s877_s0, %s877_s0, %s878_s5  }
  0x2b   :  { %867 = dma.done.wait [#allocation5], 16  }
  0x2c   :  { %868 = vsyncadd [#allocation5], 4294967280 }
  0x2d   :  { %869 = dma.done.wait [#allocation3], 1280  }
  0x2e   :  { %870 = vsyncadd [#allocation3], 4294966016 }
  0x2f   :  { %871 = dma.done.wait [#allocation8], 640  }
  0x30   :  { %872 = vsyncadd [#allocation8], 4294966656 }
  0x31   :  { %53 = sfence }
  0x32   :  { %v57_v0 = vld [vmem:[#allocation7 + $0x8] sm:$0xff]  ;;  %vm71_vm0 = vcmask 64512   ;;  %v61_v1 = vld [vmem:[#allocation6] sm:$0xff]  ;;  %v880_v2 = vmov 0.0   ;;  %vm881_vm1 = vmmov 0   ;;  %v62_v3 = vld [vmem:[#allocation6 + $0x8] sm:$0xff]  ;;  %v627_v53 = vlaneseq }
  0x33   :  { %702 = vmatprep.subr.mxu1 %v880_v2  ;;  %704 = vmatprep.mubr.msk.f32.mxu1 %vm881_vm1, %v880_v2  ;;  %v750_v4 = vpack.c.bf16 %v62_v3, %v61_v1  ;;  %v882_v5 = vmov 0.0|0.0   ;;  %v56_v6 = vld [vmem:[#allocation7] sm:$0xff]  ;;  %vm145_vm2 = vcmask 130048   ;;  %v59_v8 = vld [vmem:[#allocation7 + $0x18] sm:$0xff]  ;;  %v65_v10 = vld [vmem:[#allocation6 + $0x20] sm:$0xff]  ;;  %vm387_vm3 = vcmask 261120  }
  0x34   :  { %703 = vmatpush3.msra.mxu1 %v57_v0  ;;  %714 = vmatprep.subr.mxu0 %v880_v2  ;;  %v63_v7 = vld [vmem:[#allocation6 + $0x10] sm:$0xff]  ;;  %v66_v11 = vld [vmem:[#allocation6 + $0x28] sm:$0xff]  ;;  %v68_v16 = vld [vmem:[#allocation6 + $0x38] sm:$0xff]  ;;  %s883_s2 = smov 112   ;;  %v884_v52 = vmov 1.0   ;;  %v628_v54 = vshrl.u32 %v627_v53, 7 }
  0x35   :  { %705 = vmatmul.mubr.msk.f32.vlgmr.msra.gmra.mrb[0].mxu1 %vm71_vm0, %v57_v0  ;;  %749 = vmatprep.subr.bf16.mxu1 %v882_v5  ;;  %v753_v13 = vpack.c.bf16 %v66_v11, %v65_v10  ;;  %v67_v15 = vld [vmem:[#allocation6 + $0x30] sm:$0xff]  ;;  %v670_v18 = vld [vmem:[#allocation6 + $0x18] ss:$0 sm:$0xff]  ;;  %v673_v33 = vld [vmem:[#allocation6 + $0x40] ss:$0 sm:$0xff]  ;;  %s54_s19 = sld [smem:[#allocation2]] }
  0x36   :  { %751 = vmatpush3.bf16.msra.mxu1 %v750_v4  ;;  %711 = vmatprep.mubr.msk.f32.mxu1 %vm881_vm1, %v880_v2  ;;  %v756_v19 = vpack.c.bf16 %v68_v16, %v67_v15  ;;  %v70_v35 = vld [vmem:[#allocation6 + $0x48] sm:$0xff]  ;;  %v60_v40 = vld [vmem:[#allocation7 + $0x20] sm:$0xff]  ;;  %v58_v42 = vld [vmem:[#allocation7 + $0x10] sm:$0xff]  ;;  %v629_v55 = vsub.s32 0, %v628_v54  ;;  %s666_s20 = sld [smem:[#allocation2 + $0x1]]  ;;  %s885_s21 = smov [#allocation9]  }
  0x37   :  { %719 = vmatprep.subr.mxu1 %v880_v2  ;;  %716 = vmatprep.mubr.msk.f32.mxu0 %vm881_vm1, %v880_v2  ;;  %vm760_vm4 = vmpackc.low %vm145_vm2, %vm145_vm2  ;;  %s655_s22 = sshll.u32 %s885_s21, 4  ;;  %s656_s22 = int_to_ptr.vmem [resolvable:$true] %s655_s22 }
  0x38   :  { %s845_s23 = scalar_lea.vmem %s656_s22, 128  ;;  %p850_p6 = scmp.lt.s32.totalorder %s656_s22, %s656_s22 }
  0x39   :  { %712 = vmatmul.mubr.msk.f32.vlgmr.msra.gmra.mrb[2].mxu1 %vm145_vm2, %v56_v6  ;;  %p846_p5 = scmp.ne.s32.totalorder %s656_s22, %s845_s23  ;;  %p851_p7 = scmp.lt.s32.totalorder %s845_s23, %s845_s23 }
  0x3a   :  { %720 = vmatpush3.msra.mxu1 %v63_v7  ;;  %721 = vmatprep.mubr.msk.f32.mxu1 %vm881_vm1, %v880_v2 }
  0x3b   :  { %758 = vmatprep.subr.bf16.mxu1 %v882_v5  ;;  %v637_v3 = vstv %s54_s19  ;;  %p852_p8 = por %p851_p7, %p850_p6 }
  0x3d   :  { %722 = vmatmul.mubr.msk.f32.vlgmr.msra.gmra.mrb[4].mxu1 %vm71_vm0, %v59_v8  ;;  %p853_p9 = pnand %p852_p8, %p846_p5 }
  0x3e   :  { %739 = vmatprep.mubr.msk.f32.mxu1 %vm881_vm1, %v880_v2 }
 0x108   :  { %v141_v9 = vpop.f32.mrb[0].mxu1 }
 0x109   :  { %v706_v12 = vpop.f32.mrb[1].mxu1 }
 0x10c   :  { %v215_v14 = vpop.f32.mrb[2].mxu1 }
 0x10d   :  { %v713_v17 = vpop.f32.mrb[3].mxu1  ;;  %715 = vmatpush3.msra.mxu0 %v215_v14 }
 0x10e   :  { %717 = vmatmul.mubr.msk.f32.vlgmr.msra.gmra.mrb[0].mxu0 %vm71_vm0, %v141_v9  ;;  %752 = vmatprep.subr.bf16.mxu0 %v882_v5 }
 0x10f   :  { %754 = vmatpush3.bf16.msra.mxu0 %v753_v13  ;;  %732 = vmatprep.mubr.msk.f32.mxu0 %vm881_vm1, %v880_v2 }
 0x110   :  { %v373_v20 = vpop.f32.mrb[4].mxu1  ;;  %755 = vmatprep.subr.bf16.mxu0 %v882_v5 }
 0x111   :  { %v374_v21 = vadd.f32 %v670_v18, %v373_v20  ;;  %v723_v22 = vpop.f32.mrb[5].mxu1 }
 0x113   :  { %v672_v23 = vmul.f32 -1.442695, %v374_v21  ;;  %757 = vmatpush3.bf16.msra.mxu0 %v756_v19 }
 0x114   :  { %762 = vmatprep.subr.bf16.mxu0 %v882_v5  ;;  %v639_v5 = vstv %s666_s20 }
 0x115   :  { %777 = vpow2.f32 %v672_v23 }
 0x11f   :  { %v778_v24 = vpop.eup %777 }
 0x120   :  { %v380_v25 = vadd.f32 1.0, %v778_v24 }
 0x122   :  { %779 = vrcp.f32 %v380_v25 }
 0x12c   :  { %v780_v26 = vpop.eup %779 }
 0x12d   :  { %733 = vmatmul.mubr.msk.f32.vlgmr.msra.gmra.mrb[2].mxu0 %vm387_vm3, %v780_v26 }
 0x12e   :  { %746 = vmatprep.mubr.msk.f32.mxu0 %vm881_vm1, %v880_v2 }
 0x1e1   :  { %v288_v27 = vpop.f32.mrb[0].mxu0 }
 0x1e2   :  { %v292_v28 = vmul.f32 1.442695, %v288_v27  ;;  %v718_v29 = vpop.f32.mrb[1].mxu0 }
 0x1e4   :  { %781 = vpow2.f32 %v292_v28 }
 0x1ee   :  { %v782_v30 = vpop.eup %781 }
 0x1ef   :  { %295 = vrot.lane.b32.xlu0 %v782_v30, %s883_s2 }
 0x200   :  { %v457_v31 = vpop.f32.mrb[2].mxu0 }
 0x201   :  { %v734_v32 = vpop.f32.mrb[3].mxu0  ;;  %v458_v34 = vadd.f32 %v673_v33, %v457_v31 }
 0x203   :  { %v461_v36 = vmul.f32 %v458_v34, %v70_v35 }
 0x205   :  { %v462_v37 = vmax.f32 %v461_v36, 0.0 }
 0x207   :  { %v463_v38 = vmul.f32 1.442695, %v462_v37 }
 0x209   :  { %783 = vpow2.f32 %v463_v38 }
 0x213   :  { %v784_v39 = vpop.eup %783 }
 0x214   :  { %v465_v41 = vmul.f32 %v784_v39, %v60_v40 }
 0x216   :  { %v466_v44 = vadd.f32 %v465_v41, %v462_v37 }
 0x218   :  { %v544_v49 = vmul.f32 %v466_v44, %v466_v44 }
 0x261   :  { %v296_v43 = vpop.permute.xlu0 %295 }
 0x262   :  { %v298_v45 = vmul.f32 %v296_v43, %v58_v42 }
 0x264   :  { %v299_v46 = vadd.f32 %v298_v45, %v288_v27 }
 0x266   :  { %v759_v47 = vpack.c.bf16 %v466_v44, %v299_v46  ;;  %v543_v48 = vmul.f32 %v299_v46, %v299_v46 }
 0x268   :  { %761 = vmatpush3.bf16.xpose.msk.msra.mxu1 %vm760_vm4, %v759_v47  ;;  %v624_v50 = vsel %vm145_vm2, %v543_v48, 0.0  ;;  %v763_v51 = vpack.c.bf16 %v544_v49, %v543_v48 }
 0x269   :  { %625 = vadd.xlane.f32.xlu0 %v624_v50 }
 0x26a   :  { %765 = vmatpush3.bf16.xpose.msk.msra.mxu0 %vm760_vm4, %v763_v51 }
 0x26f   :  { %740 = vmatmul.mubr.msk.f32.vlgmr.msra.gmra.mrb[6].mxu1 %vm145_vm2, %v299_v46 }
 0x271   :  { %747 = vmatmul.mubr.msk.f32.vlgmr.msra.gmra.mrb[4].mxu0 %vm145_vm2, %v884_v52 }
 0x2f6   :  { %v626_v61 = vpop.xlane.xlu0 %625 }
 0x342   :  { %v539_v56 = vpop.f32.mrb[6].mxu1 }
 0x343   :  { %v741_v57 = vpop.f32.mrb[7].mxu1  ;;  %v632_v62 = vmul.f32 2.0, %v539_v56 }
 0x344   :  { %v620_v58 = vpop.f32.mrb[4].mxu0 }
 0x345   :  { %v630_v59 = vrot.slane %v620_v58, %v629_v55  ;;  %v748_v60 = vpop.f32.mrb[5].mxu0 }
 0x347   :  { %v631_v63 = vadd.f32 %v630_v59, %v626_v61 }
 0x349   :  { %v633_v0 = vsub.f32 %v631_v63, %v632_v62 }
 0x34b   :  { %v634_v1 = vmax.f32 %v633_v0, 0.0 }
 0x34d   :  { %v635_v2 = vadd.f32 1e-10, %v634_v1 }
 0x34f   :  { %785 = vrsqrt.f32 %v635_v2 }
 0x359   :  { %v786_v4 = vpop.eup %785 }
 0x35a   :  { %v638_v6 = vmul.f32 %v786_v4, %v637_v3 }
 0x35c   :  { %v640_v7 = vsub.f32 %v638_v6, %v639_v5 }
 0x35e   :  { %v681_v8 = vmul.f32 -1.442695, %v640_v7 }
 0x360   :  { %787 = vpow2.f32 %v681_v8 }
 0x36a   :  { %v788_v9 = vpop.eup %787 }
 0x36b   :  { %v644_v10 = vadd.f32 1.0, %v788_v9 }
 0x36d   :  { %789 = vrcp.f32 %v644_v10 }
 0x377   :  { %v790_v11 = vpop.eup %789 }
 0x378   :  { %v647_v12 = vsel %vm145_vm2, %v790_v11, 0.0 }
 0x379   :  { %648 = vst [vmem:[#allocation9] sm:$0xff] %v647_v12 }
 0x37a   :  { %856 = shalt.err (!%p853_p9)
}
 0x37b   :  { %s857_s26 = scalar_lea.hbm %s974_s3, 128 }
 0x37c   :  { %p858_p10 = scmp.ne.s32.totalorder %s974_s3, %s857_s26  ;;  %p861_p11 = scmp.lt.u32.totalorder %s857_s26, %s974_s3 }
 0x37e   :  { %p863_p12 = pnand %p861_p11, %p858_p10 }
 0x380   :  { %866 = shalt.err (!%p863_p12)
}
 0x381   :  { %658 = dma.vmem_to_hbm [thread:$0]  %s656_s22, 128, %s974_s3, [#allocation4]  }
 0x382   :  { %873 = dma.done.wait [#allocation4], 128  }
 0x383   :  { %874 = vsyncadd [#allocation4], 4294967168 }
 0x384   :  { %662 = vsyncpa [#allocation3], 1 }
 0x385   :  { %663 = vsyncpa [#allocation8], 1 }
 0x386   :  { %664 = vsyncpa [#allocation4], 1 }
 0x387   :  { %665 = vsyncpa [#allocation5], 1 }

</bundles_post_ra>
